<compile_context>
chip_gen: v6e
topology: v6e:2x2x1
jax: 0.10.0
libtpu: 0.0.40
codegen_flags: <defaults>
</compile_context>

<pallas_src>
import math
import functools

import jax
import jax.numpy as jnp
from jax import lax
from jax.experimental import pallas as pl
from jax.experimental.pallas import tpu as pltpu

_NEG_BIG = -1e30

# pltpu.CompilerParams compat (older JAX spelled it TPUCompilerParams).
_CompilerParamsCls = getattr(pltpu, "CompilerParams", None)
if _CompilerParamsCls is None:  # pragma: no cover
    _CompilerParamsCls = getattr(pltpu, "TPUCompilerParams")


def _round_up(n, m):
    return ((n + m - 1) // m) * m


def _pad2(w, rows, cols):
    """Zero-pad a 2-D f32 array to (rows, cols)."""
    return jnp.zeros((rows, cols), jnp.float32).at[: w.shape[0], : w.shape[1]].set(w)


# ----------------------------------------------------- hardware-aware config
def _vmem_capacity_bytes():
    try:
        return int(getattr(pltpu.get_tpu_info(), "vmem_capacity_bytes"))
    except Exception:
        return 128 << 20  # conservative default (v5e/v6e class)


_BUFFERED_SUPPORTED = None


def _buffered_supported():
    """Probe once whether BlockSpec(pipeline_mode=pl.Buffered(n)) lowers on
    this JAX/TPU combo; fall back to default double-buffering otherwise."""
    global _BUFFERED_SUPPORTED
    if _BUFFERED_SUPPORTED is not None:
        return _BUFFERED_SUPPORTED
    if not hasattr(pl, "Buffered"):
        _BUFFERED_SUPPORTED = False
        return False

    def _probe_kernel(x_ref, o_ref):
        o_ref[...] = x_ref[...] * 2.0

    try:
        spec = pl.BlockSpec((8, 128), lambda l: (0, 0),
                            pipeline_mode=pl.Buffered(1))
        out = pl.pallas_call(
            _probe_kernel,
            out_shape=jax.ShapeDtypeStruct((8, 128), jnp.float32),
            grid=(2,),
            in_specs=[spec],
            out_specs=pl.BlockSpec((8, 128), lambda l: (0, 0)),
        )(jnp.zeros((8, 128), jnp.float32))
        jax.block_until_ready(out)
        _BUFFERED_SUPPORTED = True
    except Exception:
        _BUFFERED_SUPPORTED = False
    return _BUFFERED_SUPPORTED


def _spec(shape, index_map, buffers=None):
    """BlockSpec with optional reduced pipelining depth (VMEM saver)."""
    if buffers is not None and _buffered_supported():
        return pl.BlockSpec(shape, index_map, pipeline_mode=pl.Buffered(buffers))
    return pl.BlockSpec(shape, index_map)


def _compiler_params(buf_bytes, vmem_cap):
    if vmem_cap <= (64 << 20):
        hi = 50 << 20    # v7x-class: leave headroom under 64 MiB/TC
    else:
        hi = 100 << 20   # v5e/v6e: 128 MiB physical
    limit = int(min(max(2 * buf_bytes + (16 << 20), 32 << 20), hi))
    return _CompilerParamsCls(dimension_semantics=("arbitrary",),
                              vmem_limit_bytes=limit)


# ------------------------------------------------------------------ kernels
def linear_stack_kernel(x_ref, w_ref, b_ref, a_ref, o_ref):
    """grid=(L,): state y lives in o_ref; y_l = PReLU(y_{l-1} @ W_l + b_l)."""
    l = pl.program_id(0)

    @pl.when(l == 0)
    def _():
        o_ref[...] = x_ref[...]

    x = o_ref[...]
    y = jnp.dot(x.astype(jnp.bfloat16), w_ref[...],
                preferred_element_type=jnp.float32) + b_ref[...]
    o_ref[...] = jnp.where(y >= 0.0, y, a_ref[...] * y)


def rgit_stack_kernel(x_ref, bias_ref, wqkv_ref, bqkv_ref,
                      w1_ref, b1_ref, a1_ref, w2_ref, b2_ref, a2_ref,
                      o_ref, *, eps, dp):
    """grid=(L,): one RGIT layer per grid step (heads=1, edge_dim=None,
    dropout=0, eval mode). State x lives in o_ref across layers."""
    l = pl.program_id(0)

    @pl.when(l == 0)
    def _():
        o_ref[...] = x_ref[...]

    x = o_ref[...]
    xb = x.astype(jnp.bfloat16)

    # Fused q/k/v projection; 1/sqrt(out_channels) is pre-folded into the q
    # slice of wqkv/bqkv in the wrapper.
    qkv = jnp.dot(xb, wqkv_ref[...],
                  preferred_element_type=jnp.float32) + bqkv_ref[...]
    q = qkv[:, :dp]
    k = qkv[:, dp:2 * dp]
    v = qkv[:, 2 * dp:]

    # scores[i, j] = <q_i, k_j> (already scaled); contract last dims (no k.T).
    scores = lax.dot_general(q.astype(jnp.bfloat16), k.astype(jnp.bfloat16),
                             (((1,), (1,)), ((), ())),
                             preferred_element_type=jnp.float32)

    # Masked softmax over incoming edges: additive bias = 0 on edges,
    # -1e30 off edges.  Element-wise math stays in f32 (v5e VPU/EUP).
    masked = scores + bias_ref[...].astype(jnp.float32)  # no-op cast if f32 mask
    m = jnp.max(masked, axis=-1, keepdims=True)
    p = jnp.exp(masked - m)                       # exactly 0 on non-edges
    denom = jnp.sum(p, axis=-1, keepdims=True)    # >= 1

    # Deferred normalization: matmul the un-normalized p, then scale the
    # (NP, DP) result -> saves two O(NP^2) VPU passes per layer.
    agg = jnp.dot(p.astype(jnp.bfloat16), v.astype(jnp.bfloat16),
                  preferred_element_type=jnp.float32)
    agg = agg * pl.reciprocal(denom, approx=True)
    # Nodes with no incoming edge get a zero aggregated message ('add' aggr).
    agg = jnp.where(m > jnp.float32(-1e29), agg, 0.0)

    out = agg + (1.0 + eps) * x                   # heads=1: out.mean(dim=1) is identity

    # inner nn: Linear -> PReLU -> Linear -> PReLU
    h = jnp.dot(out.astype(jnp.bfloat16), w1_ref[...],
                preferred_element_type=jnp.float32) + b1_ref[...]
    h = jnp.where(h >= 0.0, h, a1_ref[...] * h)
    h = jnp.dot(h.astype(jnp.bfloat16), w2_ref[...],
                preferred_element_type=jnp.float32) + b2_ref[...]
    o_ref[...] = jnp.where(h >= 0.0, h, a2_ref[...] * h)


# ----------------------------------------------------------------- wrappers
def linear_prelu_stack(x, w, b, a, *, vmem_cap):
    NP, DP = x.shape
    L = w.shape[0]
    buf = 2 * NP * DP * 4 + 2 * (DP * DP * 2 + 2 * DP * 4)
    return pl.pallas_call(
        linear_stack_kernel,
        out_shape=jax.ShapeDtypeStruct((NP, DP), jnp.float32),
        grid_spec=pltpu.PrefetchScalarGridSpec(
            num_scalar_prefetch=0,
            grid=(L,),
            in_specs=[
                _spec((NP, DP), lambda l: (0, 0), buffers=1),       # x (read at l==0)
                _spec((None, DP, DP), lambda l: (l, 0, 0)),         # W_l (bf16)
                _spec((None, 1, DP), lambda l: (l, 0, 0)),          # b_l
                _spec((None, 1, DP), lambda l: (l, 0, 0)),          # prelu slope
            ],
            out_specs=pl.BlockSpec((NP, DP), lambda l: (0, 0)),
        ),
        input_output_aliases={0: 0},
        compiler_params=_compiler_params(buf, vmem_cap),
    )(x, w, b, a)


def rgit_stack(x, bias, wqkv, bqkv, w1, b1, a1, w2, b2, a2, *, eps, vmem_cap):
    NP, DP = x.shape
    L = wqkv.shape[0]
    mask_bytes = jnp.dtype(bias.dtype).itemsize
    # On VMEM-tight chips with big models, single-buffer the weight blocks too.
    weight_buffers = 1 if (DP >= 1024 and vmem_cap <= (64 << 20)) else None
    buf = (2 * NP * DP * 4                                   # x in + resident out
           + NP * NP * mask_bytes                            # additive mask
           + 2 * (DP * 3 * DP * 2 + 3 * DP * 4
                  + 2 * DP * DP * 2 + 4 * DP * 4)            # per-layer weights
           + 3 * NP * NP * 4 + NP * 3 * DP * 4)              # softmax / qkv temporaries
    kern = functools.partial(rgit_stack_kernel, eps=eps, dp=DP)
    return pl.pallas_call(
        kern,
        out_shape=jax.ShapeDtypeStruct((NP, DP), jnp.float32),
        grid_spec=pltpu.PrefetchScalarGridSpec(
            num_scalar_prefetch=0,
            grid=(L,),
            in_specs=[
                _spec((NP, DP), lambda l: (0, 0), buffers=1),              # x
                _spec((NP, NP), lambda l: (0, 0), buffers=1),              # additive mask
                _spec((None, DP, 3 * DP), lambda l: (l, 0, 0),
                      buffers=weight_buffers),                             # Wqkv (bf16)
                _spec((None, 1, 3 * DP), lambda l: (l, 0, 0)),             # bqkv
                _spec((None, DP, DP), lambda l: (l, 0, 0),
                      buffers=weight_buffers),                             # W1 (bf16)
                _spec((None, 1, DP), lambda l: (l, 0, 0)),                 # b1
                _spec((None, 1, DP), lambda l: (l, 0, 0)),                 # a1
                _spec((None, DP, DP), lambda l: (l, 0, 0),
                      buffers=weight_buffers),                             # W2 (bf16)
                _spec((None, 1, DP), lambda l: (l, 0, 0)),                 # b2
                _spec((None, 1, DP), lambda l: (l, 0, 0)),                 # a2
            ],
            out_specs=pl.BlockSpec((NP, DP), lambda l: (0, 0)),
        ),
        input_output_aliases={0: 0},
        compiler_params=_compiler_params(buf, vmem_cap),
    )(x, bias, wqkv, bqkv, w1, b1, a1, w2, b2, a2)


def rgit_mod_forward(x, edge_index, params, eps=0.0):
    N, D = x.shape
    NP = _round_up(N, 128)   # lane-dense scores / mask, full MXU tiles
    DP = _round_up(D, 128)

    vmem_cap = _vmem_capacity_bytes()
    # f32 mask on 128-MiB-VMEM chips (no per-layer cast); bf16 on v7x-class.
    mask_dtype = jnp.bfloat16 if vmem_cap <= (64 << 20) else jnp.float32

    # Pad node features to lane-dense shape; padded channels/rows stay inert
    # (padded columns remain exactly 0; padded rows are masked off in attention).
    xp = jnp.zeros((NP, DP), jnp.float32).at[:N, :D].set(x)

    # Additive attention bias built directly: 0 iff edge j -> i, else -1e30.
    # TODO(synk): duplicate (parallel) edges collapse to one mask entry; a true
    # edge-level softmax on multigraphs would need an edge-list kernel.
    # TODO(synk): for large N (v7x VMEM wall ~1.5k nodes) switch to flash-style
    # query-row tiling with a second "parallel" grid axis so both v7x
    # TensorCores split each layer.
    bias = (jnp.full((NP, NP), _NEG_BIG, jnp.float32)
            .at[edge_index[1], edge_index[0]].set(0.0)
            .astype(mask_dtype))

    if params["linears"]:
        w = jnp.stack([_pad2(p["w"], DP, DP) for p in params["linears"]]).astype(jnp.bfloat16)
        b = jnp.stack([_pad2(p["b"], 1, DP) for p in params["linears"]])
        a = jnp.stack([_pad2(p["a"], 1, DP) for p in params["linears"]])
        xp = linear_prelu_stack(xp, w, b, a, vmem_cap=vmem_cap)

    if params["rgit"]:
        scale = 1.0 / math.sqrt(D)  # out_channels of the reference RGIT layer
        wqkv = jnp.stack([jnp.concatenate(
            [_pad2(p["wq"] * scale, DP, DP), _pad2(p["wk"], DP, DP),
             _pad2(p["wv"], DP, DP)], axis=1) for p in params["rgit"]]).astype(jnp.bfloat16)
        bqkv = jnp.stack([jnp.concatenate(
            [_pad2(p["bq"] * scale, 1, DP), _pad2(p["bk"], 1, DP),
             _pad2(p["bv"], 1, DP)], axis=1) for p in params["rgit"]])
        w1 = jnp.stack([_pad2(p["w1"], DP, DP) for p in params["rgit"]]).astype(jnp.bfloat16)
        b1 = jnp.stack([_pad2(p["b1"], 1, DP) for p in params["rgit"]])
        a1 = jnp.stack([_pad2(p["a1"], 1, DP) for p in params["rgit"]])
        w2 = jnp.stack([_pad2(p["w2"], DP, DP) for p in params["rgit"]]).astype(jnp.bfloat16)
        b2 = jnp.stack([_pad2(p["b2"], 1, DP) for p in params["rgit"]])
        a2 = jnp.stack([_pad2(p["a2"], 1, DP) for p in params["rgit"]])
        xp = rgit_stack(xp, bias, wqkv, bqkv, w1, b1, a1, w2, b2, a2,
                        eps=eps, vmem_cap=vmem_cap)

    return xp[:N, :D]


# ------------------------------------------------------------------- params
def _linear_init(key, fan_in, fan_out):
    kw, kb = jax.random.split(key)
    bound = 1.0 / math.sqrt(fan_in)
    w = jax.random.uniform(kw, (fan_in, fan_out), jnp.float32, -bound, bound)
    b = jax.random.uniform(kb, (1, fan_out), jnp.float32, -bound, bound)
    return w, b


def init_params(key, dim_h, num_layers, num_linear_layers):
    params = {"linears": [], "rgit": []}
    for _ in range(num_linear_layers):
        key, sub = jax.random.split(key)
        w, b = _linear_init(sub, dim_h, dim_h)
        params["linears"].append(
            {"w": w, "b": b, "a": jnp.full((1, dim_h), 0.25, jnp.float32)})
    for _ in range(num_layers):
        layer = {}
        for name in ("q", "k", "v"):
            key, sub = jax.random.split(key)
            w, b = _linear_init(sub, dim_h, dim_h)
            layer["w" + name], layer["b" + name] = w, b
        for idx in ("1", "2"):
            key, sub = jax.random.split(key)
            w, b = _linear_init(sub, dim_h, dim_h)
            layer["w" + idx], layer["b" + idx] = w, b
            layer["a" + idx] = jnp.full((1, dim_h), 0.25, jnp.float32)
        params["rgit"].append(layer)
    return params


# --------------------------------------------------------------------- main
if __name__ == "__main__":
    key = jax.random.PRNGKey(0)
    dim_h, num_layers, num_linear_layers = 32, 2, 1
    num_nodes = 16

    kx, kp = jax.random.split(key)
    x = jax.random.normal(kx, (num_nodes, dim_h), jnp.float32)

    # deterministic edge set: a ring plus a strided set of extra edges
    src = jnp.array([i for i in range(num_nodes)]
                    + [(3 * i) % num_nodes for i in range(num_nodes)],
                    dtype=jnp.int32)
    dst = jnp.array([(i + 1) % num_nodes for i in range(num_nodes)]
                    + [(5 * i + 1) % num_nodes for i in range(num_nodes)],
                    dtype=jnp.int32)
    edge_index = jnp.stack([src, dst])  # (2, E), PyG convention

    params = init_params(kp, dim_h, num_layers, num_linear_layers)

    out = rgit_mod_forward(x, edge_index, params)
    out = jax.block_until_ready(out)
    assert out.shape == (num_nodes, dim_h)
    assert bool(jnp.all(jnp.isfinite(out)))
    print("KERNEL_OK")
</pallas_src>

<mosaic_0001>
module attributes {stable_mosaic.version = 11 : i64} {
  func.func @_probe_kernel(%arg0: i32, %arg1: memref<8x128xf32, #tpu.memory_space<vmem>>, %arg2: memref<8x128xf32, #tpu.memory_space<vmem>>) attributes {dimension_semantics = [#tpu.dimension_semantics<arbitrary>], iteration_bounds = array<i64: 2>, scalar_prefetch = 0 : i64, scratch_operands = 0 : i64, tpu.core_type = #tpu.core_type<tc>, window_params = [{pipeline_mode = #tpu.pipeline_mode<synchronous>, transform_indices = @transform_0, window_bounds = array<i64: 8, 128>}, {pipeline_mode = #tpu.pipeline_mode<synchronous>, transform_indices = @transform_1, window_bounds = array<i64: 8, 128>}]} {
    %c0 = arith.constant 0 : index
    %c0_0 = arith.constant 0 : index
    %0 = vector.load %arg1[%c0, %c0_0] : memref<8x128xf32, #tpu.memory_space<vmem>>, vector<8x128xf32>
    %cst = arith.constant 2.000000e+00 : f32
    %1 = vector.broadcast %cst : f32 to vector<8x128xf32>
    %2 = arith.mulf %0, %1 : vector<8x128xf32>
    %c0_1 = arith.constant 0 : index
    %c0_2 = arith.constant 0 : index
    %3 = vector.load %arg2[%c0_1, %c0_2] : memref<8x128xf32, #tpu.memory_space<vmem>>, vector<8x128xf32>
    tpu.vector_store %arg2[%c0_1, %c0_2], %2 {strides = array<i32>} : memref<8x128xf32, #tpu.memory_space<vmem>>, vector<8x128xf32>,
    return
  }
  func.func @transform_0(%arg0: i32) -> (i32, i32) {
    %c0_i32 = arith.constant 0 : i32
    %c0_i32_0 = arith.constant 0 : i32
    %c0_i32_1 = arith.constant 0 : i32
    return %c0_i32, %c0_i32_0 : i32, i32
  }
  func.func @transform_1(%arg0: i32) -> (i32, i32) {
    %c0_i32 = arith.constant 0 : i32
    %c0_i32_0 = arith.constant 0 : i32
    %c0_i32_1 = arith.constant 0 : i32
    return %c0_i32, %c0_i32_0 : i32, i32
  }
}

module attributes {stable_mosaic.version = 11 : i64} {
  func.func @linear_stack_kernel(%arg0: i32, %arg1: memref<128x128xf32, #tpu.memory_space<vmem>>, %arg2: memref<1x128x128xbf16, #tpu.memory_space<vmem>>, %arg3: memref<1x1x128xf32, #tpu.memory_space<vmem>>, %arg4: memref<1x1x128xf32, #tpu.memory_space<vmem>>, %arg5: memref<128x128xf32, #tpu.memory_space<vmem>>) attributes {dimension_semantics = [#tpu.dimension_semantics<arbitrary>], iteration_bounds = array<i64: 1>, scalar_prefetch = 0 : i64, scratch_operands = 0 : i64, tpu.core_type = #tpu.core_type<tc>, window_params = [{pipeline_mode = #tpu.pipeline_mode<synchronous>, transform_indices = @transform_0, window_bounds = array<i64: 128, 128>}, {transform_indices = @transform_1, window_bounds = array<i64: 1, 128, 128>}, {transform_indices = @transform_2, window_bounds = array<i64: 1, 1, 128>}, {transform_indices = @transform_3, window_bounds = array<i64: 1, 1, 128>}, {pipeline_mode = #tpu.pipeline_mode<synchronous>, transform_indices = @transform_4, window_bounds = array<i64: 128, 128>}]} {
    %c0_i32 = arith.constant 0 : i32
    %0 = arith.cmpi eq, %arg0, %c0_i32 : i32
    %1 = arith.extui %0 : i1 to i32
    %c0_i32_0 = arith.constant 0 : i32
    %2 = arith.cmpi ne, %1, %c0_i32_0 : i32
    scf.if %2 {
      %c0_14 = arith.constant 0 : index
      %c0_15 = arith.constant 0 : index
      %20 = vector.load %arg1[%c0_14, %c0_15] : memref<128x128xf32, #tpu.memory_space<vmem>>, vector<128x128xf32>
      %c0_16 = arith.constant 0 : index
      %c0_17 = arith.constant 0 : index
      %21 = vector.load %arg5[%c0_16, %c0_17] : memref<128x128xf32, #tpu.memory_space<vmem>>, vector<128x128xf32>
      tpu.vector_store %arg5[%c0_16, %c0_17], %20 {strides = array<i32>} : memref<128x128xf32, #tpu.memory_space<vmem>>, vector<128x128xf32>,
    } else {
    }
    %c0 = arith.constant 0 : index
    %c0_1 = arith.constant 0 : index
    %3 = vector.load %arg5[%c0, %c0_1] : memref<128x128xf32, #tpu.memory_space<vmem>>, vector<128x128xf32>
    %4 = arith.truncf %3 : vector<128x128xf32> to vector<128x128xbf16>
    %c0_2 = arith.constant 0 : index
    %c0_3 = arith.constant 0 : index
    %c0_4 = arith.constant 0 : index
    %5 = vector.load %arg2[%c0_2, %c0_3, %c0_4] : memref<1x128x128xbf16, #tpu.memory_space<vmem>>, vector<1x128x128xbf16>
    %6 = vector.shape_cast %5 : vector<1x128x128xbf16> to vector<128x128xbf16>
    %cst = arith.constant dense<0.000000e+00> : vector<128x128xf32>
    %7 = tpu.matmul %4, %6, %cst {dimension_numbers = #tpu.dot_dimension_numbers<[1], [0], [0], [1], [0, 0, 1, 1], [], []>} : vector<128x128xbf16>, vector<128x128xbf16>, vector<128x128xf32> -> vector<128x128xf32>
    %c0_5 = arith.constant 0 : index
    %c0_6 = arith.constant 0 : index
    %c0_7 = arith.constant 0 : index
    %8 = vector.load %arg3[%c0_5, %c0_6, %c0_7] : memref<1x1x128xf32, #tpu.memory_space<vmem>>, vector<1x1x128xf32>
    %9 = vector.shape_cast %8 : vector<1x1x128xf32> to vector<1x128xf32>
    %10 = vector.broadcast %9 : vector<1x128xf32> to vector<128x128xf32>
    %11 = arith.addf %7, %10 : vector<128x128xf32>
    %cst_8 = arith.constant 0.000000e+00 : f32
    %12 = vector.broadcast %cst_8 : f32 to vector<128x128xf32>
    %13 = arith.cmpf oge, %11, %12 : vector<128x128xf32>
    %c0_9 = arith.constant 0 : index
    %c0_10 = arith.constant 0 : index
    %c0_11 = arith.constant 0 : index
    %14 = vector.load %arg4[%c0_9, %c0_10, %c0_11] : memref<1x1x128xf32, #tpu.memory_space<vmem>>, vector<1x1x128xf32>
    %15 = vector.shape_cast %14 : vector<1x1x128xf32> to vector<1x128xf32>
    %16 = vector.broadcast %15 : vector<1x128xf32> to vector<128x128xf32>
    %17 = arith.mulf %16, %11 : vector<128x128xf32>
    %18 = arith.select %13, %11, %17 : vector<128x128xi1>, vector<128x128xf32>
    %c0_12 = arith.constant 0 : index
    %c0_13 = arith.constant 0 : index
    %19 = vector.load %arg5[%c0_12, %c0_13] : memref<128x128xf32, #tpu.memory_space<vmem>>, vector<128x128xf32>
    tpu.vector_store %arg5[%c0_12, %c0_13], %18 {strides = array<i32>} : memref<128x128xf32, #tpu.memory_space<vmem>>, vector<128x128xf32>,
    return
  }
  func.func @transform_0(%arg0: i32) -> (i32, i32) {
    %c0_i32 = arith.constant 0 : i32
    %c0_i32_0 = arith.constant 0 : i32
    %c0_i32_1 = arith.constant 0 : i32
    return %c0_i32, %c0_i32_0 : i32, i32
  }
  func.func @transform_1(%arg0: i32) -> (i32, i32, i32) {
    %c0_i32 = arith.constant 0 : i32
    %c0_i32_0 = arith.constant 0 : i32
    %c0_i32_1 = arith.constant 0 : i32
    return %arg0, %c0_i32, %c0_i32_0 : i32, i32, i32
  }
  func.func @transform_2(%arg0: i32) -> (i32, i32, i32) {
    %c0_i32 = arith.constant 0 : i32
    %c0_i32_0 = arith.constant 0 : i32
    %c0_i32_1 = arith.constant 0 : i32
    return %arg0, %c0_i32, %c0_i32_0 : i32, i32, i32
  }
  func.func @transform_3(%arg0: i32) -> (i32, i32, i32) {
    %c0_i32 = arith.constant 0 : i32
    %c0_i32_0 = arith.constant 0 : i32
    %c0_i32_1 = arith.constant 0 : i32
    return %arg0, %c0_i32, %c0_i32_0 : i32, i32, i32
  }
  func.func @transform_4(%arg0: i32) -> (i32, i32) {
    %c0_i32 = arith.constant 0 : i32
    %c0_i32_0 = arith.constant 0 : i32
    %c0_i32_1 = arith.constant 0 : i32
    return %c0_i32, %c0_i32_0 : i32, i32
  }
}

</mosaic_0001>

<bundles_post_ra>
// kernel: tpu_custom_call.1
= control target key start
LH: loop header
LB: loop body
LE: loop exit
PB: predicated region body
PF: predicated region fallthrough
CT: control target
= control target key end

     0   :  { %6 = vsyncpa [#allocation3], 0  ;;  %s305_s0 = inlined_call_operand.hbm [shape: f32[8,128], index: 0, kind: input, shape index: {}]   ;;  %s306_s1 = inlined_call_operand.hbm [shape: f32[8,128], index: 1, kind: output, shape index: {}]  }
   0x1   :  { %7 = vsyncpa [#allocation4], 0  ;;  %s258_s6 = smov 0  }
   0x2 LB: > { %s145_s7 = sadd.s32 4294967295, %s244_s6   ;;  %p146_p0 = scmp.ge.s32.totalorder %s244_s6, 1  ;;  %s244_s6 = sphi %s258_s6, %s13_s6  }
   0x3   : > { %p60_p1 = scmp.lt.s32.totalorder %s244_s6, 3  ;;  %p270_p3 = scmp.eq.s32.totalorder %s145_s7, 0 }
   0x4   : > { %s246_s10 = smov [#allocation2]  }
   0x5   : > { %p266_p2 = pnand %p146_p0, %p60_p1  ;;  %s73_s11 = sshll.u32 %s246_s10, 4  ;;  %s74_s11 = int_to_ptr.vmem [resolvable:$true] %s73_s11 }
   0x6   : > { %s191_s12 = scalar_lea.vmem %s74_s11, 128  ;;  %p199_p10 = scmp.lt.s32.totalorder %s74_s11, %s74_s11 }
   0x7   : > { %p162_p4 = pneg %p266_p2  ;;  %p192_p7 = scmp.ne.s32.totalorder %s74_s11, %s191_s12 }
   0x8   : > { %p200_p11 = scmp.lt.s32.totalorder %s191_s12, %s191_s12 }
   0x9   : > { %p163_p5 = pnand %p270_p3, %p162_p4 }
   0xa   : > { %p201_p12 = por %p200_p11, %p199_p10 }
   0xb   : > { %p182_p6 = pneg %p163_p5 }
   0xd   : > { %p194_p8 = pnand %p192_p7, %p182_p6 }
   0xf   : > { %p195_p9 = pneg %p194_p8 }
  0x11   : > { %p202_p13 = pnand %p201_p12, %p195_p9 }
  0x13   : > { %205 = shalt.err (!%p202_p13)
}
  0x14   : > { %165 = dma.hbm_to_vmem [thread:$0]  (!%p163_p5), %s305_s0, 128, %s74_s11, [#allocation3]  }
  0x15   : > { %86 = sbr.rel (%p266_p2) target bundleno = 42 (0x2a), region = 24 }
  0x1a   : > { %235 = dma.done.wait (%p270_p3), [#allocation3], 128  }
  0x1b   : > { %237 = vsyncadd (%p270_p3), [#allocation3], 4294967168  ;;  %s247_s15 = smov [#allocation5]   ;;  %v96_v0 = vld [vmem:[#allocation2] sm:$0xff]  ;;  %p287_p0 = scmp.eq.s32.totalorder %s145_s7, 1 }
  0x1c   : > { %s106_s16 = sshll.u32 %s247_s15, 4  ;;  %v97_v1 = vmul.f32 2.0, %v96_v0  ;;  %s107_s16 = int_to_ptr.vmem [resolvable:$true] %s106_s16 }
  0x1d   : > { %s206_s18 = scalar_lea.vmem %s107_s16, 128  ;;  %p213_p5 = scmp.lt.s32.totalorder %s107_s16, %s107_s16 }
  0x1e   : > { %98 = vst [vmem:[#allocation5] sm:$0xff] %v97_v1  ;;  %p207_p1 = scmp.ne.s32.totalorder %s107_s16, %s206_s18  ;;  %p214_p6 = scmp.lt.s32.totalorder %s206_s18, %s206_s18 }
  0x20   : > { %p208_p2 = pnand %p207_p1, %p287_p0  ;;  %p215_p7 = por %p214_p6, %p213_p5 }
  0x22   : > { %p209_p4 = pneg %p208_p2 }
  0x24   : > { %p216_p3 = pnand %p215_p7, %p209_p4 }
  0x26   : > { %219 = shalt.err (!%p216_p3)
}
  0x27   : > { %159 = dma.vmem_to_hbm [thread:$0]  (%p287_p0), %s107_s16, 128, %s306_s1, [#allocation4]  }
  0x28   : > { %239 = dma.done.wait (%p287_p0), [#allocation4], 128  }
  0x29   : > { %241 = vsyncadd (%p287_p0), [#allocation4], 4294967168 }
  0x2a PF: > { %s13_s6 = sadd.s32 1, %s244_s6  }
  0x2b   : > { %p10_p8 = scmp.ge.s32.totalorder %s13_s6, 4  }
  0x2d   :  { %12 = sbr.rel (!%p10_p8) target bundleno = 2 (0x2), region = 53 }
  0x32   :  { %119 = vsyncpa [#allocation3], 1 }
  0x33   :  { %121 = vsyncpa [#allocation3 + $0x1], 1 }
  0x34   :  { %122 = vsyncpa [#allocation4], 1 }
  0x35   :  { %124 = vsyncpa [#allocation4 + $0x1], 1 }

// kernel: tpu_custom_call.1
= control target key start
LH: loop header
LB: loop body
LE: loop exit
PB: predicated region body
PF: predicated region fallthrough
CT: control target
= control target key end

     0   :  { %9 = vsyncpa [#allocation3], 0  ;;  %s586_s0 = inlined_call_operand.hbm [shape: f32[128,128], index: 0, kind: input, shape index: {}, may-alias: {0,4}]   ;;  %s587_s1 = inlined_call_operand.vmem [shape: bf16[1,128,128], index: 1, kind: input, shape index: {}]   ;;  %s588_s2 = inlined_call_operand.vmem [shape: f32[1,1,128], index: 2, kind: input, shape index: {}]   ;;  %s589_s3 = inlined_call_operand.vmem [shape: f32[1,1,128], index: 3, kind: input, shape index: {}]   ;;  %s590_s4 = inlined_call_operand.hbm [shape: f32[128,128], index: 4, kind: output, shape index: {}, may-alias: {0,4}]  }
   0x1   :  { %10 = vsyncpa [#allocation4], 0  ;;  %s479_s15 = smov [#allocation2]  }
   0x2   :  { %s16_s16 = sshll.u32 %s479_s15, 4  ;;  %s17_s16 = int_to_ptr.vmem [resolvable:$true] %s16_s16 }
   0x3   :  { %s443_s17 = scalar_lea.vmem %s17_s16, 2048  ;;  %p448_p1 = scmp.lt.s32.totalorder %s17_s16, %s17_s16 }
   0x4   :  { %p444_p0 = scmp.ne.s32.totalorder %s17_s16, %s443_s17  ;;  %p449_p2 = scmp.lt.s32.totalorder %s443_s17, %s443_s17 }
   0x6   :  { %p450_p3 = por %p449_p2, %p448_p1 }
   0x8   :  { %p451_p4 = pnand %p450_p3, %p444_p0 }
   0xa   :  { %454 = shalt.err (!%p451_p4)
}
   0xb   :  { %s480_s18 = smov 128   ;;  %s481_s19 = smov 8  }
   0xc   :  { %22 = dma.hbm_to_vmem [thread:$0]  %s586_s0, 2048, %s17_s16, [#allocation3], %s480_s18, %s480_s18, %s481_s19  }
   0xd   :  { %475 = dma.done.wait [#allocation3], 2048  }
   0xe   :  { %476 = vsyncadd [#allocation3], 4294965248  ;;  %v427_v0 = vld [vmem:[%s587_s1 + $0x38] sm:$0xff]   ;;  %v428_v1 = vld [vmem:[%s587_s1 + $0x30] sm:$0xff]  }
   0xf   :  { %375 = vmatprep.subr.bf16.mxu0 %v427_v0  ;;  %407 = vmatprep.subr.bf16.mxu1 %v427_v0  ;;  %v429_v2 = vld [vmem:[%s587_s1 + $0x28] sm:$0xff]   ;;  %v430_v3 = vld [vmem:[%s587_s1 + $0x20] sm:$0xff]   ;;  %v431_v10 = vld [vmem:[%s587_s1 + $0x18] sm:$0xff]  }
  0x10   :  { %376 = vmatpush3.bf16.msra.mxu0 %v427_v0  ;;  %415 = vmatpush3.bf16.msra.mxu1 %v427_v0  ;;  %v37_v4 = vld [vmem:[#allocation2] sm:$0xff]  ;;  %v38_v5 = vld [vmem:[#allocation2 + $0x8] sm:$0xff]  ;;  %v432_v11 = vld [vmem:[%s587_s1 + $0x10] sm:$0xff]  }
  0x11   :  { %377 = vmatprep.subr.bf16.mxu0 %v428_v1  ;;  %408 = vmatprep.subr.bf16.mxu1 %v428_v1  ;;  %v45_v6 = vld [vmem:[#allocation2 + $0x40] sm:$0xff]  ;;  %v85_v7 = vpack.c.bf16 %v38_v5, %v37_v4  ;;  %v46_v8 = vld [vmem:[#allocation2 + $0x48] sm:$0xff]  ;;  %v39_v14 = vld [vmem:[#allocation2 + $0x10] sm:$0xff] }
  0x12   :  { %v89_v9 = vpack.c.bf16 %v46_v8, %v45_v6  ;;  %v433_v12 = vld [vmem:[%s587_s1 + $0x8] sm:$0xff]   ;;  %v434_v13 = vld [vmem:[%s587_s1] sm:$0xff]   ;;  %v40_v15 = vld [vmem:[#allocation2 + $0x18] sm:$0xff] }
  0x13   :  { %391 = vmatprep.mubr.bf16.mxu0 %v85_v7  ;;  %v47_v16 = vld [vmem:[#allocation2 + $0x50] sm:$0xff]  ;;  %v48_v17 = vld [vmem:[#allocation2 + $0x58] sm:$0xff]  ;;  %v41_v18 = vld [vmem:[#allocation2 + $0x20] sm:$0xff]  ;;  %v86_v22 = vpack.c.bf16 %v40_v15, %v39_v14 }
  0x14   :  { %378 = vmatpush3.bf16.msra.mxu0 %v428_v1  ;;  %416 = vmatpush3.bf16.msra.mxu1 %v428_v1  ;;  %v42_v19 = vld [vmem:[#allocation2 + $0x28] sm:$0xff]  ;;  %v49_v20 = vld [vmem:[#allocation2 + $0x60] sm:$0xff]  ;;  %v90_v23 = vpack.c.bf16 %v48_v17, %v47_v16  ;;  %v43_v26 = vld [vmem:[#allocation2 + $0x30] sm:$0xff] }
  0x15   :  { %379 = vmatprep.subr.bf16.mxu0 %v429_v2  ;;  %409 = vmatprep.subr.bf16.mxu1 %v429_v2  ;;  %v50_v21 = vld [vmem:[#allocation2 + $0x68] sm:$0xff]  ;;  %v87_v24 = vpack.c.bf16 %v42_v19, %v41_v18  ;;  %v44_v27 = vld [vmem:[#allocation2 + $0x38] sm:$0xff]  ;;  %v51_v28 = vld [vmem:[#allocation2 + $0x70] sm:$0xff] }
  0x16   :  { %399 = vmatprep.mubr.bf16.mxu1 %v89_v9  ;;  %v91_v25 = vpack.c.bf16 %v50_v21, %v49_v20  ;;  %v52_v29 = vld [vmem:[#allocation2 + $0x78] sm:$0xff]  ;;  %v88_v30 = vpack.c.bf16 %v44_v27, %v43_v26  ;;  %v541_v32 = vld [vmem:[%s588_s2] ss:$0 sm:$0xff]  ;;  %s482_s2 = smov [#allocation5]  }
  0x17   :  { %v92_v31 = vpack.c.bf16 %v52_v29, %v51_v28  ;;  %v546_v34 = vld [vmem:[%s589_s3] ss:$0 sm:$0xff]  ;;  %s337_s3 = sshll.u32 %s482_s2, 4  ;;  %s338_s3 = int_to_ptr.vmem [resolvable:$true] %s337_s3 }
  0x18   :  { %380 = vmatpush3.bf16.msra.mxu0 %v429_v2  ;;  %417 = vmatpush3.bf16.msra.mxu1 %v429_v2  ;;  %s455_s14 = scalar_lea.vmem %s338_s3, 2048  ;;  %p460_p6 = scmp.lt.s32.totalorder %s338_s3, %s338_s3 }
  0x19   :  { %381 = vmatprep.subr.bf16.mxu0 %v430_v3  ;;  %410 = vmatprep.subr.bf16.mxu1 %v430_v3  ;;  %p456_p5 = scmp.ne.s32.totalorder %s338_s3, %s455_s14  ;;  %p461_p7 = scmp.lt.s32.totalorder %s455_s14, %s455_s14 }
  0x1b   :  { %p462_p8 = por %p461_p7, %p460_p6 }
  0x1c   :  { %382 = vmatpush3.bf16.msra.mxu0 %v430_v3  ;;  %418 = vmatpush3.bf16.msra.mxu1 %v430_v3 }
  0x1d   :  { %383 = vmatprep.subr.bf16.mxu0 %v431_v10  ;;  %411 = vmatprep.subr.bf16.mxu1 %v431_v10  ;;  %p463_p9 = pnand %p462_p8, %p456_p5 }
  0x20   :  { %384 = vmatpush3.bf16.msra.mxu0 %v431_v10  ;;  %419 = vmatpush3.bf16.msra.mxu1 %v431_v10 }
  0x21   :  { %385 = vmatprep.subr.bf16.mxu0 %v432_v11  ;;  %412 = vmatprep.subr.bf16.mxu1 %v432_v11 }
  0x24   :  { %386 = vmatpush3.bf16.msra.mxu0 %v432_v11  ;;  %420 = vmatpush3.bf16.msra.mxu1 %v432_v11 }
  0x25   :  { %387 = vmatprep.subr.bf16.mxu0 %v433_v12  ;;  %413 = vmatprep.subr.bf16.mxu1 %v433_v12 }
  0x28   :  { %388 = vmatpush3.bf16.msra.mxu0 %v433_v12  ;;  %421 = vmatpush3.bf16.msra.mxu1 %v433_v12 }
  0x29   :  { %389 = vmatprep.subr.bf16.mxu0 %v434_v13  ;;  %414 = vmatprep.subr.bf16.mxu1 %v434_v13 }
  0x2c   :  { %390 = vmatpush3.bf16.msra.mxu0 %v434_v13  ;;  %422 = vmatpush3.bf16.msra.mxu1 %v434_v13 }
  0x2f   :  { %392 = vmatmul.mubr.bf16.vlgmr.msra.gmra.mxu0 %v86_v22  ;;  %400 = vmatmul.mubr.bf16.vlgmr.msra.gmra.mxu1 %v90_v23 }
  0x30   :  { %395 = vmatprep.mubr.bf16.mxu0 %v87_v24  ;;  %403 = vmatprep.mubr.bf16.mxu1 %v91_v25 }
  0x37   :  { %396 = vmatmul.mubr.bf16.gmra.mxu0 %v88_v30  ;;  %404 = vmatmul.mubr.bf16.gmra.mxu1 %v92_v31 }
  0xef   :  { %v393_v33 = vpop.f32.mrf.mxu0  ;;  %v401_v35 = vpop.f32.mrf.mxu1 }
  0xf0   :  { %v207_v36 = vadd.f32 %v393_v33, %v541_v32  ;;  %v239_v37 = vadd.f32 %v401_v35, %v541_v32 }
  0xf1   :  { %v198_v38 = vpop.f32.mrf.mxu0  ;;  %v230_v39 = vpop.f32.mrf.mxu1 }
  0xf2   :  { %vm263_vm0 = vcmp.ge.f32.partialorder %v207_v36, 0.0  ;;  %v286_v40 = vmul.f32 %v546_v34, %v207_v36  ;;  %vm271_vm1 = vcmp.ge.f32.partialorder %v239_v37, 0.0  ;;  %v294_v41 = vmul.f32 %v546_v34, %v239_v37 }
  0xf3   :  { %v199_v42 = vadd.f32 %v541_v32, %v198_v38  ;;  %v231_v43 = vadd.f32 %v541_v32, %v230_v39  ;;  %v394_v44 = vpop.f32.mrf.mxu0  ;;  %v402_v45 = vpop.f32.mrf.mxu1 }
  0xf4   :  { %v302_v46 = vsel %vm263_vm0, %v207_v36, %v286_v40  ;;  %v310_v47 = vsel %vm271_vm1, %v239_v37, %v294_v41  ;;  %v210_v48 = vadd.f32 %v394_v44, %v541_v32  ;;  %v242_v49 = vadd.f32 %v402_v45, %v541_v32 }
  0xf5   :  { %318 = vst [vmem:[#allocation5 + $0x10] sm:$0xff] %v302_v46  ;;  %326 = vst [vmem:[#allocation5 + $0x50] sm:$0xff] %v310_v47  ;;  %vm261_vm2 = vcmp.ge.f32.partialorder %v199_v42, 0.0  ;;  %v284_v50 = vmul.f32 %v546_v34, %v199_v42  ;;  %vm269_vm3 = vcmp.ge.f32.partialorder %v231_v43, 0.0  ;;  %v292_v51 = vmul.f32 %v546_v34, %v231_v43  ;;  %v201_v52 = vpop.f32.mrf.mxu0  ;;  %v233_v53 = vpop.f32.mrf.mxu1 }
  0xf6   :  { %vm264_vm4 = vcmp.ge.f32.partialorder %v210_v48, 0.0  ;;  %v287_v54 = vmul.f32 %v546_v34, %v210_v48  ;;  %vm272_vm5 = vcmp.ge.f32.partialorder %v242_v49, 0.0  ;;  %v295_v55 = vmul.f32 %v546_v34, %v242_v49 }
  0xf7   :  { %v300_v56 = vsel %vm261_vm2, %v199_v42, %v284_v50  ;;  %v308_v57 = vsel %vm269_vm3, %v231_v43, %v292_v51  ;;  %v202_v58 = vadd.f32 %v541_v32, %v201_v52  ;;  %v234_v59 = vadd.f32 %v541_v32, %v233_v53  ;;  %v397_v60 = vpop.f32.mrf.mxu0  ;;  %v405_v61 = vpop.f32.mrf.mxu1 }
  0xf8   :  { %316 = vst [vmem:[#allocation5] sm:$0xff] %v300_v56  ;;  %324 = vst [vmem:[#allocation5 + $0x40] sm:$0xff] %v308_v57  ;;  %v303_v62 = vsel %vm264_vm4, %v210_v48, %v287_v54  ;;  %v311_v63 = vsel %vm272_vm5, %v242_v49, %v295_v55  ;;  %v223_v0 = vadd.f32 %v397_v60, %v541_v32 }
  0xf9   :  { %v255_v1 = vadd.f32 %v405_v61, %v541_v32  ;;  %319 = vst [vmem:[#allocation5 + $0x18] sm:$0xff] %v303_v62  ;;  %327 = vst [vmem:[#allocation5 + $0x58] sm:$0xff] %v311_v63  ;;  %vm262_vm6 = vcmp.ge.f32.partialorder %v202_v58, 0.0  ;;  %v285_v2 = vmul.f32 %v546_v34, %v202_v58  ;;  %vm270_vm7 = vcmp.ge.f32.partialorder %v234_v59, 0.0  ;;  %v214_v4 = vpop.f32.mrf.mxu0  ;;  %v246_v5 = vpop.f32.mrf.mxu1 }
  0xfa   :  { %v293_v3 = vmul.f32 %v546_v34, %v234_v59  ;;  %vm267_vm8 = vcmp.ge.f32.partialorder %v223_v0, 0.0  ;;  %v290_v6 = vmul.f32 %v546_v34, %v223_v0  ;;  %v215_v10 = vadd.f32 %v541_v32, %v214_v4 }
  0xfb   :  { %vm275_vm9 = vcmp.ge.f32.partialorder %v255_v1, 0.0  ;;  %v298_v7 = vmul.f32 %v546_v34, %v255_v1  ;;  %v301_v8 = vsel %vm262_vm6, %v202_v58, %v285_v2  ;;  %v247_v11 = vadd.f32 %v541_v32, %v246_v5  ;;  %v398_v12 = vpop.f32.mrf.mxu0  ;;  %v406_v13 = vpop.f32.mrf.mxu1 }
  0xfc   :  { %v309_v9 = vsel %vm270_vm7, %v234_v59, %v293_v3  ;;  %317 = vst [vmem:[#allocation5 + $0x8] sm:$0xff] %v301_v8  ;;  %v306_v14 = vsel %vm267_vm8, %v223_v0, %v290_v6  ;;  %v226_v16 = vadd.f32 %v398_v12, %v541_v32  ;;  %v258_v17 = vadd.f32 %v406_v13, %v541_v32 }
  0xfd   :  { %325 = vst [vmem:[#allocation5 + $0x48] sm:$0xff] %v309_v9  ;;  %v314_v15 = vsel %vm275_vm9, %v255_v1, %v298_v7  ;;  %322 = vst [vmem:[#allocation5 + $0x30] sm:$0xff] %v306_v14  ;;  %vm265_vm10 = vcmp.ge.f32.partialorder %v215_v10, 0.0  ;;  %v288_v18 = vmul.f32 %v546_v34, %v215_v10  ;;  %vm273_vm11 = vcmp.ge.f32.partialorder %v247_v11, 0.0  ;;  %v217_v20 = vpop.f32.mrf.mxu0  ;;  %v249_v21 = vpop.f32.mrf.mxu1 }
  0xfe   :  { %330 = vst [vmem:[#allocation5 + $0x70] sm:$0xff] %v314_v15  ;;  %v296_v19 = vmul.f32 %v546_v34, %v247_v11  ;;  %vm268_vm12 = vcmp.ge.f32.partialorder %v226_v16, 0.0  ;;  %v291_v22 = vmul.f32 %v546_v34, %v226_v16  ;;  %vm276_vm13 = vcmp.ge.f32.partialorder %v258_v17, 0.0 }
  0xff   :  { %v299_v23 = vmul.f32 %v546_v34, %v258_v17  ;;  %v304_v24 = vsel %vm265_vm10, %v215_v10, %v288_v18  ;;  %v218_v26 = vadd.f32 %v541_v32, %v217_v20  ;;  %v250_v27 = vadd.f32 %v541_v32, %v249_v21 }
 0x100   :  { %v312_v25 = vsel %vm273_vm11, %v247_v11, %v296_v19  ;;  %320 = vst [vmem:[#allocation5 + $0x20] sm:$0xff] %v304_v24  ;;  %v307_v28 = vsel %vm268_vm12, %v226_v16, %v291_v22 }
 0x101   :  { %328 = vst [vmem:[#allocation5 + $0x60] sm:$0xff] %v312_v25  ;;  %v315_v29 = vsel %vm276_vm13, %v258_v17, %v299_v23  ;;  %323 = vst [vmem:[#allocation5 + $0x38] sm:$0xff] %v307_v28  ;;  %vm266_vm14 = vcmp.ge.f32.partialorder %v218_v26, 0.0  ;;  %v289_v30 = vmul.f32 %v546_v34, %v218_v26  ;;  %vm274_vm15 = vcmp.ge.f32.partialorder %v250_v27, 0.0 }
 0x102   :  { %331 = vst [vmem:[#allocation5 + $0x78] sm:$0xff] %v315_v29  ;;  %v297_v31 = vmul.f32 %v546_v34, %v250_v27 }
 0x103   :  { %v305_v33 = vsel %vm266_vm14, %v218_v26, %v289_v30 }
 0x104   :  { %v313_v35 = vsel %vm274_vm15, %v250_v27, %v297_v31  ;;  %321 = vst [vmem:[#allocation5 + $0x28] sm:$0xff] %v305_v33 }
 0x105   :  { %329 = vst [vmem:[#allocation5 + $0x68] sm:$0xff] %v313_v35 }
 0x106   :  { %466 = shalt.err (!%p463_p9)
}
 0x107   :  { %343 = dma.vmem_to_hbm [thread:$0]  %s338_s3, 2048, %s590_s4, [#allocation4], %s480_s18, %s480_s18, %s481_s19  }
 0x108   :  { %477 = dma.done.wait [#allocation4], 2048  }
 0x109   :  { %478 = vsyncadd [#allocation4], 4294965248 }
 0x10a   :  { %347 = vsyncpa [#allocation3], 1 }
 0x10b   :  { %348 = vsyncpa [#allocation4], 1 }

</bundles_post_ra>
